<compile_context>
chip_gen: v7x
topology: tpu7x:2x2x1
jax: 0.10.0
libtpu: 0.0.40
codegen_flags: <defaults>
</compile_context>

<pallas_src>
import jax
import jax.numpy as jnp
from jax import lax
from jax.experimental import pallas as pl
from jax.experimental.pallas import tpu as pltpu


def _round_up(x, m):
    return (x + m - 1) // m * m


def make_conv_block_kernel(t_tile, c_in_p, c_out_p, kernel_size, dilation,
                           padding, pad_off, use_eq, mm_dtype):
    """Grid = (B, NT); time axis is 'arbitrary' (sequential) so the causal halo
    is carried in VMEM scratch instead of being re-read / duplicated in HBM."""
    w_out = 2 * c_out_p if use_eq else c_out_p
    pad_r = pad_off + padding          # 8-aligned sublane offset of the x tile

    def kernel(x_ref, w_ref, bconv_ref, wrs_ref, brs_ref, *rest):
        if use_eq:
            beq_ref, out_ref, xh_ref = rest
        else:
            out_ref, xh_ref = rest

        t = pl.program_id(1)

        # ---- causal carry -------------------------------------------------
        if padding > 0:
            @pl.when(t == 0)
            def _():
                # rows [0, pad_r): the causal left zero-pad for the first tile.
                xh_ref[0:pad_r, :] = jnp.zeros((pad_r, c_in_p), mm_dtype)

        # Stage the current tile at an 8-aligned offset (aligned, lane-dense
        # store).  xh_ref rows [pad_off, pad_r + TT) == x_pad[t*TT : t*TT+pad+TT].
        x_tile = x_ref[0]                                        # (TT, C_in_p)
        xh_ref[pad_r:pad_r + t_tile, :] = x_tile.astype(mm_dtype)

        # ---- dilated conv: K accumulating MXU dots (eq fused as extra cols) --
        acc = jnp.zeros((t_tile, w_out), jnp.float32)
        for k in range(kernel_size):
            off = pad_off + dilation * k
            xk = xh_ref[off:off + t_tile, :]                     # (TT, C_in_p)
            acc = acc + jnp.dot(xk, w_ref[k],
                                preferred_element_type=jnp.float32)

        conv = acc[:, :c_out_p] + bconv_ref[...]
        if padding > 0:
            # F.pad semantics: rows with global t < padding are exactly zero
            # (then sin(0) == 0).  Cheap (TT, 1) column mask broadcast by select.
            row = t * t_tile + lax.broadcasted_iota(jnp.int32, (t_tile, 1), 0)
            conv = jnp.where(row >= padding, conv, 0.0)
        y = jnp.sin(conv)                                        # (TT, C_out_p) f32

        # ---- fused residual|skip 1x1 convs: one matmul, 2*C_out_p lanes -----
        rs = jnp.dot(y.astype(mm_dtype), wrs_ref[...],
                     preferred_element_type=jnp.float32) + brs_ref[...]

        # ---- channel-equalized / identity input for the residual ------------
        if use_eq:
            x_match = acc[:, c_out_p:] + beq_ref[...]
        else:
            # exact identity path: stored-precision x (no bf16 rounding).
            x_match = x_tile.astype(jnp.float32)

        res_half = (rs[:, :c_out_p] + x_match) * 0.5
        merged = jnp.concatenate([res_half, rs[:, c_out_p:]], axis=-1)
        out_ref[0] = merged.astype(out_ref.dtype)                # one 2C-lane block

        # ---- advance the causal carry (last `padding` rows of the window) ---
        if padding > 0:
            xh_ref[pad_off:pad_r, :] = xh_ref[pad_off + t_tile:
                                              pad_r + t_tile, :]

    return kernel


def conv_block_forward(x_btc, params, kernel_size, dilation, *,
                       t_tile=512, matmul_dtype=jnp.bfloat16,
                       out_dtype=jnp.bfloat16):
    """x_btc: (B, T, C_in).  Returns (out, skip), each (B, T, C_out) in out_dtype.

    x is consumed in its stored dtype (cast to matmul_dtype only for MXU
    operands inside the kernel), so the identity residual stays exact when the
    caller provides f32.  In a stacked model pass bf16 activations end-to-end.
    """
    B, T, C_in = x_btc.shape
    K = kernel_size
    C_out = params["w_conv"].shape[-1]
    use_eq = C_in != C_out
    pad = dilation * (K - 1)

    C_in_p = _round_up(C_in, 128)
    C_out_p = _round_up(C_out, 128)
    W_out = 2 * C_out_p if use_eq else C_out_p

    TT = min(_round_up(T, 8), _round_up(t_tile, 8))
    NT = pl.cdiv(T, TT)
    T_tiled = NT * TT

    pad_r = _round_up(pad, 8) if pad > 0 else 0
    pad_off = pad_r - pad

    # Right-pad time to a tile multiple, lane-pad channels (caller dtype kept).
    x_p = jnp.pad(x_btc, ((0, 0), (0, T_tiled - T), (0, C_in_p - C_in)))

    def pad2(a, shape):
        return jnp.pad(a, [(0, s - d) for s, d in zip(shape, a.shape)])

    # Fused conv weights (K, C_in_p, W_out); equalize_channels rides as extra
    # output columns of the k = K-1 tap (x[t] is exactly that tap).
    w = jnp.zeros((K, C_in_p, W_out), jnp.float32)
    w = w.at[:, :C_in, :C_out].set(params["w_conv"])
    if use_eq:
        w = w.at[K - 1, :C_in, C_out_p:C_out_p + C_out].set(params["w_eq"])
    w = w.astype(matmul_dtype)

    b_conv = pad2(params["b_conv"], (1, C_out_p)).astype(jnp.float32)
    w_rs = jnp.concatenate([pad2(params["w_res"], (C_out_p, C_out_p)),
                            pad2(params["w_skip"], (C_out_p, C_out_p))],
                           axis=1).astype(matmul_dtype)
    b_rs = jnp.concatenate([pad2(params["b_res"], (1, C_out_p)),
                            pad2(params["b_skip"], (1, C_out_p))],
                           axis=1).astype(jnp.float32)

    in_specs = [
        pl.BlockSpec((1, TT, C_in_p), lambda b, t: (b, t, 0)),        # x tile
        pl.BlockSpec((K, C_in_p, W_out), lambda b, t: (0, 0, 0)),     # conv(+eq) W
        pl.BlockSpec((1, C_out_p), lambda b, t: (0, 0)),              # conv bias
        pl.BlockSpec((C_out_p, 2 * C_out_p), lambda b, t: (0, 0)),    # res|skip W
        pl.BlockSpec((1, 2 * C_out_p), lambda b, t: (0, 0)),          # res|skip bias
    ]
    args = [x_p, w, b_conv, w_rs, b_rs]
    if use_eq:
        b_eq = pad2(params["b_eq"], (1, C_out_p)).astype(jnp.float32)
        in_specs.append(pl.BlockSpec((1, C_out_p), lambda b, t: (0, 0)))
        args.append(b_eq)

    # Merged out|skip output: one lane-dense 2*C_out_p-wide DMA stream per step.
    out_specs = pl.BlockSpec((1, TT, 2 * C_out_p), lambda b, t: (b, t, 0))
    out_shape = jax.ShapeDtypeStruct((B, T_tiled, 2 * C_out_p), out_dtype)

    flops = 2 * B * T_tiled * (K * C_in_p * W_out + C_out_p * 2 * C_out_p)
    bytes_accessed = (int(x_p.size) * x_p.dtype.itemsize
                      + sum(int(a.size) * a.dtype.itemsize for a in args[1:])
                      + B * T_tiled * 2 * C_out_p * jnp.dtype(out_dtype).itemsize)
    cost = pl.CostEstimate(flops=int(flops),
                           transcendentals=int(B * T_tiled * C_out_p),
                           bytes_accessed=int(bytes_accessed))

    kernel = make_conv_block_kernel(TT, C_in_p, C_out_p, K, dilation, pad,
                                    pad_off, use_eq, matmul_dtype)

    # NOTE(v7x): both TensorCores are fed via the "parallel" batch axis; the
    # time axis must stay "arbitrary" (sequential) because of the carried halo.
    # If B == 1 and both cores are needed, fall back to a halo'd parallel time
    # split instead of the carry.
    merged = pl.pallas_call(
        kernel,
        grid=(B, NT),
        in_specs=in_specs,
        out_specs=out_specs,
        out_shape=out_shape,
        scratch_shapes=[pltpu.VMEM((pad_r + TT, C_in_p), matmul_dtype)],
        cost_estimate=cost,
        compiler_params=pltpu.CompilerParams(
            dimension_semantics=("parallel", "arbitrary"),
            # Per-step footprint is well under 2 MiB even at TT=512; set the
            # scoped limit explicitly so the same config is safe on v7x (64 MiB
            # physical / 32 MiB scoped default) as well as v5e/v6e.
            vmem_limit_bytes=32 * 1024 * 1024),
    )(*args)

    # Drop time/lane padding (padded channels carry exact zeros).
    out = merged[:, :T, :C_out]
    skip = merged[:, :T, C_out_p:C_out_p + C_out]
    return out, skip


def conv_block_reference(x_btc, params, kernel_size, dilation):
    """Pure-JAX f32 reference mirroring the PyTorch forward (channels-last)."""
    B, T, C_in = x_btc.shape
    K = kernel_size
    C_out = params["w_conv"].shape[-1]
    pad = dilation * (K - 1)
    T_valid = T - pad

    y_valid = jnp.zeros((B, T_valid, C_out), jnp.float32)
    for k in range(K):
        xk = x_btc[:, k * dilation:k * dilation + T_valid, :]
        y_valid = y_valid + jnp.einsum("btc,cd->btd", xk, params["w_conv"][k])
    y_valid = y_valid + params["b_conv"]
    y = jnp.concatenate(
        [jnp.zeros((B, pad, C_out), jnp.float32), y_valid], axis=1)
    y = jnp.sin(y)

    residual = jnp.einsum("btc,cd->btd", y, params["w_res"]) + params["b_res"]
    skip = jnp.einsum("btc,cd->btd", y, params["w_skip"]) + params["b_skip"]
    if C_in != C_out:
        x_m = jnp.einsum("btc,cd->btd", x_btc, params["w_eq"]) + params["b_eq"]
    else:
        x_m = x_btc
    return (residual + x_m) * 0.5, skip


def init_params(key, ch_in, ch_out, kernel_size):
    """Deterministic synthetic parameters (shapes match the nn.Module)."""
    ks = jax.random.split(key, 8)
    bound_res = jnp.sqrt(6.0 / ch_out)
    bound_eq = jnp.sqrt(6.0 / ch_in)
    params = {
        # nn.Conv1d(ch_in, ch_out, K) weight is (ch_out, ch_in, K); stored (K, ch_in, ch_out)
        "w_conv": jax.random.normal(ks[0], (kernel_size, ch_in, ch_out),
                                    jnp.float32) * 0.3,
        "b_conv": jax.random.normal(ks[1], (1, ch_out), jnp.float32) * 0.1,
        "w_res": jax.random.uniform(ks[2], (ch_out, ch_out), jnp.float32,
                                    -bound_res, bound_res),
        "b_res": jax.random.normal(ks[3], (1, ch_out), jnp.float32) * 0.1,
        "w_skip": jax.random.uniform(ks[4], (ch_out, ch_out), jnp.float32,
                                     -bound_res, bound_res),
        "b_skip": jax.random.normal(ks[5], (1, ch_out), jnp.float32) * 0.1,
    }
    if ch_in != ch_out:
        params["w_eq"] = jax.random.uniform(ks[6], (ch_in, ch_out), jnp.float32,
                                            -bound_eq, bound_eq)
        params["b_eq"] = jax.random.normal(ks[7], (1, ch_out), jnp.float32) * 0.1
    return params


if __name__ == "__main__":
    key = jax.random.PRNGKey(0)
    k_x, k_p, k_x2, k_p2 = jax.random.split(key, 4)

    # ---- Config A: ch_in != ch_out (equalize_channels path), dilation 2 ----
    B, ch_in, ch_out, T = 2, 4, 8, 20
    kernel_size, dilation = 3, 2

    x_nct = jax.random.normal(k_x, (B, ch_in, T), jnp.float32)   # PyTorch B x C x T
    params = init_params(k_p, ch_in, ch_out, kernel_size)
    x_btc = jnp.transpose(x_nct, (0, 2, 1))                      # NCT -> BTC glue

    ref_out, ref_skip = conv_block_reference(x_btc, params, kernel_size, dilation)

    # Perf path: bf16 MXU operands + bf16 outputs (f32 accumulation inside).
    # t_tile=8 forces multiple time tiles so the carried-halo path is exercised.
    out_bf, skip_bf = conv_block_forward(x_btc, params, kernel_size, dilation,
                                         t_tile=8, matmul_dtype=jnp.bfloat16,
                                         out_dtype=jnp.bfloat16)
    jax.block_until_ready((out_bf, skip_bf))
    assert out_bf.shape == (B, T, ch_out) and skip_bf.shape == (B, T, ch_out)
    assert jnp.allclose(out_bf.astype(jnp.float32), ref_out, rtol=5e-2, atol=5e-2)
    assert jnp.allclose(skip_bf.astype(jnp.float32), ref_skip, rtol=5e-2, atol=5e-2)

    # Default-tile path (TT capped to the sequence length) also compiles/runs.
    out_d, skip_d = conv_block_forward(x_btc, params, kernel_size, dilation)
    jax.block_until_ready((out_d, skip_d))
    assert jnp.allclose(out_d.astype(jnp.float32), ref_out, rtol=5e-2, atol=5e-2)

    # Strict structural check: f32 MXU operands + f32 outputs.
    out32, skip32 = conv_block_forward(x_btc, params, kernel_size, dilation,
                                       t_tile=8, matmul_dtype=jnp.float32,
                                       out_dtype=jnp.float32)
    jax.block_until_ready((out32, skip32))
    assert jnp.allclose(out32, ref_out, rtol=1e-4, atol=1e-4)
    assert jnp.allclose(skip32, ref_skip, rtol=1e-4, atol=1e-4)

    # ---- Config B: ch_in == ch_out (exact identity residual), pad > tile ----
    B2, ch2, T2 = 2, 8, 20
    ks2, dil2 = 3, 5                      # pad = 10 > TT = 8: multi-tile carry
    x2 = jax.random.normal(k_x2, (B2, T2, ch2), jnp.float32)
    params2 = init_params(k_p2, ch2, ch2, ks2)
    ref_out2, ref_skip2 = conv_block_reference(x2, params2, ks2, dil2)
    out2, skip2 = conv_block_forward(x2, params2, ks2, dil2, t_tile=8,
                                     matmul_dtype=jnp.float32,
                                     out_dtype=jnp.float32)
    jax.block_until_ready((out2, skip2))
    assert jnp.allclose(out2, ref_out2, rtol=1e-4, atol=1e-4)
    assert jnp.allclose(skip2, ref_skip2, rtol=1e-4, atol=1e-4)

    print("KERNEL_OK")
</pallas_src>

<mosaic_0001>
module attributes {stable_mosaic.version = 11 : i64} {
  func.func @kernel(%arg0: i32, %arg1: i32, %arg2: memref<1x8x128xf32, #tpu.memory_space<vmem>>, %arg3: memref<3x128x256xbf16, #tpu.memory_space<vmem>>, %arg4: memref<1x128xf32, #tpu.memory_space<vmem>>, %arg5: memref<128x256xbf16, #tpu.memory_space<vmem>>, %arg6: memref<1x256xf32, #tpu.memory_space<vmem>>, %arg7: memref<1x128xf32, #tpu.memory_space<vmem>>, %arg8: memref<1x8x256xbf16, #tpu.memory_space<vmem>>, %arg9: memref<16x128xbf16, #tpu.memory_space<vmem>>) attributes {dimension_semantics = [#tpu.dimension_semantics<parallel>, #tpu.dimension_semantics<arbitrary>], iteration_bounds = array<i64: 2, 3>, scalar_prefetch = 0 : i64, scratch_operands = 1 : i64, tpu.core_type = #tpu.core_type<tc>, window_params = [{transform_indices = @transform_0, window_bounds = array<i64: 1, 8, 128>}, {pipeline_mode = #tpu.pipeline_mode<synchronous>, transform_indices = @transform_1, window_bounds = array<i64: 3, 128, 256>}, {pipeline_mode = #tpu.pipeline_mode<synchronous>, transform_indices = @transform_2, window_bounds = array<i64: 1, 128>}, {pipeline_mode = #tpu.pipeline_mode<synchronous>, transform_indices = @transform_3, window_bounds = array<i64: 128, 256>}, {pipeline_mode = #tpu.pipeline_mode<synchronous>, transform_indices = @transform_4, window_bounds = array<i64: 1, 256>}, {pipeline_mode = #tpu.pipeline_mode<synchronous>, transform_indices = @transform_5, window_bounds = array<i64: 1, 128>}, {transform_indices = @transform_6, window_bounds = array<i64: 1, 8, 256>}]} {
    %c0_i32 = arith.constant 0 : i32
    %0 = arith.cmpi eq, %arg1, %c0_i32 : i32
    %1 = arith.extui %0 : i1 to i32
    %c0_i32_0 = arith.constant 0 : i32
    %2 = arith.cmpi ne, %1, %c0_i32_0 : i32
    scf.if %2 {
      %cst_35 = arith.constant 0.000000e+00 : bf16
      %60 = vector.broadcast %cst_35 : bf16 to vector<8x128xbf16>
      %c0_36 = arith.constant 0 : index
      %c0_37 = arith.constant 0 : index
      %61 = vector.load %arg9[%c0_36, %c0_37] : memref<16x128xbf16, #tpu.memory_space<vmem>>, vector<8x128xbf16>
      tpu.vector_store %arg9[%c0_36, %c0_37], %60 {strides = array<i32>} : memref<16x128xbf16, #tpu.memory_space<vmem>>, vector<8x128xbf16>,
    } else {
    }
    %c0 = arith.constant 0 : index
    %c0_1 = arith.constant 0 : index
    %c0_2 = arith.constant 0 : index
    %3 = vector.load %arg2[%c0, %c0_1, %c0_2] : memref<1x8x128xf32, #tpu.memory_space<vmem>>, vector<1x8x128xf32>
    %4 = vector.shape_cast %3 : vector<1x8x128xf32> to vector<8x128xf32>
    %5 = arith.truncf %4 : vector<8x128xf32> to vector<8x128xbf16>
    %c8 = arith.constant 8 : index
    %c0_3 = arith.constant 0 : index
    %6 = vector.load %arg9[%c8, %c0_3] : memref<16x128xbf16, #tpu.memory_space<vmem>>, vector<8x128xbf16>
    tpu.vector_store %arg9[%c8, %c0_3], %5 {strides = array<i32>} : memref<16x128xbf16, #tpu.memory_space<vmem>>, vector<8x128xbf16>,
    %cst = arith.constant 0.000000e+00 : f32
    %7 = vector.broadcast %cst : f32 to vector<8x256xf32>
    %c4 = arith.constant 4 : index
    %c0_4 = arith.constant 0 : index
    %8 = vector.load %arg9[%c4, %c0_4] : memref<16x128xbf16, #tpu.memory_space<vmem>>, vector<8x128xbf16>
    %c0_5 = arith.constant 0 : index
    %c0_6 = arith.constant 0 : index
    %c0_7 = arith.constant 0 : index
    %9 = vector.load %arg3[%c0_5, %c0_6, %c0_7] : memref<3x128x256xbf16, #tpu.memory_space<vmem>>, vector<1x128x256xbf16>
    %10 = vector.shape_cast %9 : vector<1x128x256xbf16> to vector<128x256xbf16>
    %cst_8 = arith.constant dense<0.000000e+00> : vector<8x256xf32>
    %11 = tpu.matmul %8, %10, %cst_8 {dimension_numbers = #tpu.dot_dimension_numbers<[1], [0], [0], [1], [0, 0, 1, 1], [], []>} : vector<8x128xbf16>, vector<128x256xbf16>, vector<8x256xf32> -> vector<8x256xf32>
    %12 = arith.addf %7, %11 : vector<8x256xf32>
    %c6 = arith.constant 6 : index
    %c0_9 = arith.constant 0 : index
    %13 = vector.load %arg9[%c6, %c0_9] : memref<16x128xbf16, #tpu.memory_space<vmem>>, vector<8x128xbf16>
    %c1 = arith.constant 1 : index
    %c0_10 = arith.constant 0 : index
    %c0_11 = arith.constant 0 : index
    %14 = vector.load %arg3[%c1, %c0_10, %c0_11] : memref<3x128x256xbf16, #tpu.memory_space<vmem>>, vector<1x128x256xbf16>
    %15 = vector.shape_cast %14 : vector<1x128x256xbf16> to vector<128x256xbf16>
    %cst_12 = arith.constant dense<0.000000e+00> : vector<8x256xf32>
    %16 = tpu.matmul %13, %15, %cst_12 {dimension_numbers = #tpu.dot_dimension_numbers<[1], [0], [0], [1], [0, 0, 1, 1], [], []>} : vector<8x128xbf16>, vector<128x256xbf16>, vector<8x256xf32> -> vector<8x256xf32>
    %17 = arith.addf %12, %16 : vector<8x256xf32>
    %c8_13 = arith.constant 8 : index
    %c0_14 = arith.constant 0 : index
    %18 = vector.load %arg9[%c8_13, %c0_14] : memref<16x128xbf16, #tpu.memory_space<vmem>>, vector<8x128xbf16>
    %c2 = arith.constant 2 : index
    %c0_15 = arith.constant 0 : index
    %c0_16 = arith.constant 0 : index
    %19 = vector.load %arg3[%c2, %c0_15, %c0_16] : memref<3x128x256xbf16, #tpu.memory_space<vmem>>, vector<1x128x256xbf16>
    %20 = vector.shape_cast %19 : vector<1x128x256xbf16> to vector<128x256xbf16>
    %cst_17 = arith.constant dense<0.000000e+00> : vector<8x256xf32>
    %21 = tpu.matmul %18, %20, %cst_17 {dimension_numbers = #tpu.dot_dimension_numbers<[1], [0], [0], [1], [0, 0, 1, 1], [], []>} : vector<8x128xbf16>, vector<128x256xbf16>, vector<8x256xf32> -> vector<8x256xf32>
    %22 = arith.addf %17, %21 : vector<8x256xf32>
    %23 = vector.extract_strided_slice %22 {offsets = [0, 0], sizes = [8, 128], strides = [1, 1]} : vector<8x256xf32> to vector<8x128xf32>
    %c0_18 = arith.constant 0 : index
    %c0_19 = arith.constant 0 : index
    %24 = vector.load %arg4[%c0_18, %c0_19] : memref<1x128xf32, #tpu.memory_space<vmem>>, vector<1x128xf32>
    %25 = vector.broadcast %24 : vector<1x128xf32> to vector<8x128xf32>
    %26 = arith.addf %23, %25 : vector<8x128xf32>
    %c8_i32 = arith.constant 8 : i32
    %27 = arith.muli %arg1, %c8_i32 : i32
    %28 = tpu.iota {dimensions = array<i32: 0>} : vector<8x1xi32>
    %29 = vector.broadcast %27 : i32 to vector<8x1xi32>
    %30 = arith.addi %29, %28 : vector<8x1xi32>
    %c4_i32 = arith.constant 4 : i32
    %31 = vector.broadcast %c4_i32 : i32 to vector<8x1xi32>
    %32 = arith.cmpi sge, %30, %31 : vector<8x1xi32>
    %cst_20 = arith.constant 0.000000e+00 : f32
    %33 = vector.shape_cast %32 : vector<8x1xi1> to vector<8x1xi1>
    %34 = vector.broadcast %33 : vector<8x1xi1> to vector<8x128xi1>
    %35 = vector.broadcast %cst_20 : f32 to vector<8x128xf32>
    %36 = arith.select %34, %26, %35 : vector<8x128xi1>, vector<8x128xf32>
    %37 = math.sin %36 : vector<8x128xf32>
    %38 = arith.truncf %37 : vector<8x128xf32> to vector<8x128xbf16>
    %c0_21 = arith.constant 0 : index
    %c0_22 = arith.constant 0 : index
    %39 = vector.load %arg5[%c0_21, %c0_22] : memref<128x256xbf16, #tpu.memory_space<vmem>>, vector<128x256xbf16>
    %cst_23 = arith.constant dense<0.000000e+00> : vector<8x256xf32>
    %40 = tpu.matmul %38, %39, %cst_23 {dimension_numbers = #tpu.dot_dimension_numbers<[1], [0], [0], [1], [0, 0, 1, 1], [], []>} : vector<8x128xbf16>, vector<128x256xbf16>, vector<8x256xf32> -> vector<8x256xf32>
    %c0_24 = arith.constant 0 : index
    %c0_25 = arith.constant 0 : index
    %41 = vector.load %arg6[%c0_24, %c0_25] : memref<1x256xf32, #tpu.memory_space<vmem>>, vector<1x256xf32>
    %42 = vector.broadcast %41 : vector<1x256xf32> to vector<8x256xf32>
    %43 = arith.addf %40, %42 : vector<8x256xf32>
    %44 = vector.extract_strided_slice %22 {offsets = [0, 128], sizes = [8, 128], strides = [1, 1]} : vector<8x256xf32> to vector<8x128xf32>
    %c0_26 = arith.constant 0 : index
    %c0_27 = arith.constant 0 : index
    %45 = vector.load %arg7[%c0_26, %c0_27] : memref<1x128xf32, #tpu.memory_space<vmem>>, vector<1x128xf32>
    %46 = vector.broadcast %45 : vector<1x128xf32> to vector<8x128xf32>
    %47 = arith.addf %44, %46 : vector<8x128xf32>
    %48 = vector.extract_strided_slice %43 {offsets = [0, 0], sizes = [8, 128], strides = [1, 1]} : vector<8x256xf32> to vector<8x128xf32>
    %49 = arith.addf %48, %47 : vector<8x128xf32>
    %cst_28 = arith.constant 5.000000e-01 : f32
    %50 = vector.broadcast %cst_28 : f32 to vector<8x128xf32>
    %51 = arith.mulf %49, %50 : vector<8x128xf32>
    %52 = vector.extract_strided_slice %43 {offsets = [0, 128], sizes = [8, 128], strides = [1, 1]} : vector<8x256xf32> to vector<8x128xf32>
    %53 = tpu.concatenate %51, %52 in 1 : vector<8x128xf32>, vector<8x128xf32> -> vector<8x256xf32>
    %54 = arith.truncf %53 : vector<8x256xf32> to vector<8x256xbf16>
    %c0_29 = arith.constant 0 : index
    %c0_30 = arith.constant 0 : index
    %c0_31 = arith.constant 0 : index
    %55 = vector.load %arg8[%c0_29, %c0_30, %c0_31] : memref<1x8x256xbf16, #tpu.memory_space<vmem>>, vector<1x8x256xbf16>
    %56 = vector.shape_cast %55 : vector<1x8x256xbf16> to vector<8x256xbf16>
    %57 = vector.shape_cast %54 : vector<8x256xbf16> to vector<1x8x256xbf16>
    tpu.vector_store %arg8[%c0_29, %c0_30, %c0_31], %57 {strides = array<i32>} : memref<1x8x256xbf16, #tpu.memory_space<vmem>>, vector<1x8x256xbf16>,
    %c12 = arith.constant 12 : index
    %c0_32 = arith.constant 0 : index
    %58 = vector.load %arg9[%c12, %c0_32] : memref<16x128xbf16, #tpu.memory_space<vmem>>, vector<4x128xbf16>
    %c4_33 = arith.constant 4 : index
    %c0_34 = arith.constant 0 : index
    %59 = vector.load %arg9[%c4_33, %c0_34] : memref<16x128xbf16, #tpu.memory_space<vmem>>, vector<4x128xbf16>
    tpu.vector_store %arg9[%c4_33, %c0_34], %58 {strides = array<i32>} : memref<16x128xbf16, #tpu.memory_space<vmem>>, vector<4x128xbf16>,
    return
  }
  func.func @transform_0(%arg0: i32, %arg1: i32) -> (i32, i32, i32) {
    %c0_i32 = arith.constant 0 : i32
    %c0_i32_0 = arith.constant 0 : i32
    return %arg0, %arg1, %c0_i32 : i32, i32, i32
  }
  func.func @transform_1(%arg0: i32, %arg1: i32) -> (i32, i32, i32) {
    %c0_i32 = arith.constant 0 : i32
    %c0_i32_0 = arith.constant 0 : i32
    %c0_i32_1 = arith.constant 0 : i32
    %c0_i32_2 = arith.constant 0 : i32
    return %c0_i32, %c0_i32_0, %c0_i32_1 : i32, i32, i32
  }
  func.func @transform_2(%arg0: i32, %arg1: i32) -> (i32, i32) {
    %c0_i32 = arith.constant 0 : i32
    %c0_i32_0 = arith.constant 0 : i32
    %c0_i32_1 = arith.constant 0 : i32
    return %c0_i32, %c0_i32_0 : i32, i32
  }
  func.func @transform_3(%arg0: i32, %arg1: i32) -> (i32, i32) {
    %c0_i32 = arith.constant 0 : i32
    %c0_i32_0 = arith.constant 0 : i32
    %c0_i32_1 = arith.constant 0 : i32
    return %c0_i32, %c0_i32_0 : i32, i32
  }
  func.func @transform_4(%arg0: i32, %arg1: i32) -> (i32, i32) {
    %c0_i32 = arith.constant 0 : i32
    %c0_i32_0 = arith.constant 0 : i32
    %c0_i32_1 = arith.constant 0 : i32
    return %c0_i32, %c0_i32_0 : i32, i32
  }
  func.func @transform_5(%arg0: i32, %arg1: i32) -> (i32, i32) {
    %c0_i32 = arith.constant 0 : i32
    %c0_i32_0 = arith.constant 0 : i32
    %c0_i32_1 = arith.constant 0 : i32
    return %c0_i32, %c0_i32_0 : i32, i32
  }
  func.func @transform_6(%arg0: i32, %arg1: i32) -> (i32, i32, i32) {
    %c0_i32 = arith.constant 0 : i32
    %c0_i32_0 = arith.constant 0 : i32
    return %arg0, %arg1, %c0_i32 : i32, i32, i32
  }
}

</mosaic_0001>

<bundles_post_ra>
// kernel: tpu_custom_call.1
= control target key start
LH: loop header
LB: loop body
LE: loop exit
PB: predicated region body
PF: predicated region fallthrough
CT: control target
= control target key end

     0   :  { %s2038_s0 = inlined_call_operand.hbm [shape: f32[2,24,128], index: 0, kind: input, shape index: {}]   ;;  %s2039_s1 = inlined_call_operand.hbm [shape: bf16[3,128,256], index: 1, kind: input, shape index: {}]   ;;  %s2040_s2 = inlined_call_operand.vmem [shape: f32[1,128], index: 2, kind: input, shape index: {}]   ;;  %s2041_s3 = inlined_call_operand.hbm [shape: bf16[128,256], index: 3, kind: input, shape index: {}]   ;;  %s2042_s4 = inlined_call_operand.vmem [shape: f32[1,256], index: 4, kind: input, shape index: {}]   ;;  %s2043_s5 = inlined_call_operand.vmem [shape: f32[1,128], index: 5, kind: input, shape index: {}]   ;;  %s2044_s6 = inlined_call_operand.hbm [shape: bf16[2,24,256], index: 6, kind: output, shape index: {}]  }
   0x1   :  { %2055 = sst [smem:[#allocation17_spill]] %s2039_s1 }
   0x2   :  { %2056 = sst [smem:[#allocation18_spill]] %s2041_s3 }
   0x3   :  { %2057 = sst [smem:[#allocation19_spill]] %s2044_s6 }
   0x4   :  { %11 = vsyncpa [#allocation4], 0 }
   0x5   :  { %13 = vsyncpa [#allocation4 + $0x1], 0 }
   0x6   :  { %14 = vsyncpa [#allocation7], 0 }
   0x7   :  { %15 = vsyncpa [#allocation5], 0 }
   0x8   :  { %17 = vsyncpa [#allocation5 + $0x1], 0  ;;  %s1716_s21 = smov 0   ;;  %s1718_s22 = smov 0  }
   0x9   :  { %s1720_s23 = smov 0   ;;  %s1722_s24 = smov 0  }
   0xa   :  { %s1724_s25 = smov 0   ;;  %s1726_s26 = smov 0  }
   0xb   :  { %s1728_s27 = smov 0   ;;  %s1730_s28 = smov 0  }
   0xc LB: > { %2058 = sst [smem:[#allocation13_spill]] %s1637_s21  ;;  %s1170_s29 = sadd.s32 4294967295, %s1665_s28   ;;  %s1665_s28 = sphi %s1730_s28, %s23_s28   ;;  %s1661_s27 = sphi %s1728_s27, %s2089_s27   ;;  %s1657_s26 = sphi %s1726_s26, %s2088_s26   ;;  %s1653_s25 = sphi %s1724_s25, %s2087_s25   ;;  %s1649_s24 = sphi %s1722_s24, %s2086_s24   ;;  %s1645_s23 = sphi %s1720_s23, %s2085_s23   ;;  %s1641_s22 = sphi %s1718_s22, %s2084_s22   ;;  %s1637_s21 = sphi %s1716_s21, %s2083_s21  }
   0xd   : > { %s1171_s30 = sadd.s32 4294967294, %s1665_s28   ;;  %p57_p0 = scmp.ne.s32.totalorder %s1641_s22, %s1637_s21 }
   0xe   : > { %p1760_p1 = scmp.eq.s32.totalorder %s1170_s29, 0  ;;  %p1764_p2 = scmp.eq.s32.totalorder %s1170_s29, 5 }
   0xf   : > { %p194_p3 = scmp.eq.s32.totalorder %s1171_s30, 5  ;;  %p1172_p5 = scmp.ge.s32.totalorder %s1665_s28, 1 }
  0x10   : > { %s2059_s7 = scalar_select %p1760_p1, 1, 0 }
  0x11   : > { %s2060_s8 = scalar_select %p1764_p2, 1, 0 }
  0x12   : > { %p1770_p4 = por %p1760_p1, %p57_p0  ;;  %p1775_p6 = por %p194_p3, %p57_p0 }
  0x13   : > { %p201_p7 = scmp.lt.s32.totalorder %s1665_s28, 7  ;;  %s1667_s12 = smov [#allocation6]  }
  0x14   : > { %s2061_s9 = scalar_select %p1770_p4, 1, 0 }
  0x15   : > { %s2062_s10 = scalar_select %p1775_p6, 1, 0 }
  0x16   : > { %p1780_p8 = pnand %p1172_p5, %p201_p7  ;;  %s213_s13 = sshll.u32 %s1667_s12, 4  ;;  %s214_s13 = int_to_ptr.vmem [resolvable:$true] %s213_s13 }
  0x17   : > { %2063 = sst [smem:[#allocation14_spill]] %s2062_s10  ;;  %s1668_s15 = smov [#allocation8]  }
  0x18   : > { %s2064_s11 = scalar_select %p1780_p8, 1, 0 }
  0x19   : > { %p1280_p9 = pneg %p1780_p8  ;;  %s229_s16 = sshll.u32 %s1668_s15, 4  ;;  %s1792_s16 = int_to_ptr.vmem [resolvable:$true] %s229_s16 }
  0x1a   : > { %s2066_s1 = sld [smem:[#allocation17_spill]] }
  0x1b   : > { %p1788_p10 = pnand %p1280_p9, %p1760_p1 }
  0x1d   : > { %p1479_p12 = pneg %p1788_p10 }
  0x20   : > { %s1477_s19 = scalar_lea.hbm %s2066_s1, 6144 }
  0x21   : > { %p1478_p11 = scmp.ne.s32.totalorder %s2066_s1, %s1477_s19  ;;  %p1484_p3 = scmp.lt.u32.totalorder %s1477_s19, %s2066_s1 }
  0x23   : > { %p1480_p13 = pnand %p1479_p12, %p1478_p11 }
  0x25   : > { %p1481_p0 = pneg %p1480_p13 }
  0x27   : > { %p1486_p5 = pnand %p1484_p3, %p1481_p0 }
  0x29   : > { %1489 = shalt.err (!%p1486_p5)
}
  0x2a   : > { %s1490_s15 = scalar_lea.vmem %s214_s13, 6144  ;;  %p1498_p1 = scmp.lt.s32.totalorder %s214_s13, %s214_s13 }
  0x2b   : > { %p1491_p7 = scmp.ne.s32.totalorder %s214_s13, %s1490_s15  ;;  %p1499_p4 = scmp.lt.s32.totalorder %s1490_s15, %s1490_s15 }
  0x2d   : > { %p1493_p9 = pnand %p1491_p7, %p1479_p12  ;;  %p1500_p8 = por %p1499_p4, %p1498_p1 }
  0x2f   : > { %p1494_p6 = pneg %p1493_p9 }
  0x31   : > { %p1501_p2 = pnand %p1500_p8, %p1494_p6 }
  0x33   : > { %1504 = shalt.err (!%p1501_p2)
}
  0x34   : > { %s1669_s17 = smov 128   ;;  %s1670_s18 = smov 8  }
  0x35   : > { %1283 = dma.hbm_to_vmem [thread:$0]  (!%p1788_p10), %s2066_s1, 6144, %s214_s13, [#allocation7], %s1669_s17, %s1669_s17, %s1670_s18  }
  0x36   : > { %s2067_s3 = sld [smem:[#allocation18_spill]] }
  0x3c   : > { %s1505_s12 = scalar_lea.hbm %s2067_s3, 2048 }
  0x3d   : > { %p1506_p11 = scmp.ne.s32.totalorder %s2067_s3, %s1505_s12  ;;  %p1512_p4 = scmp.lt.u32.totalorder %s1505_s12, %s2067_s3 }
  0x3f   : > { %p1508_p1 = pnand %p1506_p11, %p1479_p12 }
  0x41   : > { %p1509_p2 = pneg %p1508_p1 }
  0x43   : > { %p1514_p6 = pnand %p1512_p4, %p1509_p2 }
  0x45   : > { %1517 = shalt.err (!%p1514_p6)
}
  0x46   : > { %s1518_s13 = scalar_lea.vmem %s1792_s16, 2048  ;;  %p1526_p3 = scmp.lt.s32.totalorder %s1792_s16, %s1792_s16 }
  0x47   : > { %p1519_p8 = scmp.ne.s32.totalorder %s1792_s16, %s1518_s13  ;;  %p1527_p5 = scmp.lt.s32.totalorder %s1518_s13, %s1518_s13 }
  0x49   : > { %p1521_p13 = pnand %p1519_p8, %p1479_p12  ;;  %p1528_p7 = por %p1527_p5, %p1526_p3 }
  0x4b   : > { %p1522_p0 = pneg %p1521_p13 }
  0x4d   : > { %p1529_p9 = pnand %p1528_p7, %p1522_p0 }
  0x4f   : > { %1532 = shalt.err (!%p1529_p9)
}
  0x50   : > { %1286 = dma.hbm_to_vmem [thread:$0]  (!%p1788_p10), %s2067_s3, 2048, %s1792_s16, [#allocation7], %s1669_s17, %s1669_s17, %s1670_s18  }
  0x51   : > { %s32_s10 = sadd.s32 1, %s1657_s26  ;;  %s35_s19 = sadd.s32 1, %s1661_s27 }
  0x52   : > { %p33_p12 = scmp.ge.s32.totalorder %s32_s10, 3  ;;  %s44_s14 = sadd.s32 1, %s1645_s23 }
  0x53   : > { %p51_p11 = scmp.ne.s32.totalorder %s1645_s23, %s1641_s22  ;;  %p52_p1 = scmp.eq.s32.totalorder %s1665_s28, 0 }
  0x54   : > { %s2091_s10 = smov (%p33_p12, %s32_s10), 0  ;;  %s2093_s19 = smov (!%p33_p12, %s35_s19), %s1661_s27 }
  0x55   : > { %2068 = sst [smem:[#allocation15_spill]] %s2091_s10  ;;  %s40_s20 = ssub.s32 %s1657_s26, %s2091_s10 }
  0x56   : > { %p1852_p2 = por %p52_p1, %p51_p11  ;;  %p37_p10 = scmp.ge.s32.totalorder %s2093_s19, 2 }
  0x57   : > { %p2070_p4 = scmp.ne.s32.totalorder %s2060_s8, 0  ;;  %p1297_p8 = scmp.lt.s32.totalorder %s1665_s28, 6 }
  0x58   : > { %s249_s17 = sand.u32 1, %s1645_s23   ;;  %s2095_s19 = smov (%p37_p10, %s2093_s19), 0 }
  0x59   : > { %p1858_p6 = por %p2070_p4, %p51_p11  ;;  %s1176_s18 = sshll.u32 %s249_s17, 3 }
  0x5a   : > { %s39_s30 = ssub.s32 %s1661_s27, %s2095_s19  ;;  %s1262_s15 = smul.u32 3, %s1661_s27 }
  0x5b   : > { %s2071_s16 = scalar_select %p1858_p6, 1, 0 }
  0x5c   : > { %s41_s12 = sor.u32 %s40_s20, %s39_s30  ;;  %s253_s13 = scalar_lea.vmem [#allocation3], %s1176_s18 }
  0x5d   : > { %2072 = sst [smem:[#allocation16_spill]] %s2071_s16  ;;  %p42_p13 = scmp.eq.s32.totalorder %s41_s12, 0 }
  0x5e   : > { %s262_s6 = sshll.u32 %s253_s13, 4  ;;  %s258_s21 = sadd.s32 %s1657_s26, %s1262_s15  ;;  %s1870_s6 = int_to_ptr.vmem [resolvable:$true] %s262_s6 }
  0x5f   : > { %s1873_s8 = scalar_select %p42_p13, %s1645_s23, %s44_s14  }
  0x60   : > { %s1177_s1 = sshll.u32 %s258_s21, 7  ;;  %p1879_p0 = pnand %p1297_p8, %p1852_p2 }
  0x61   : > { %s1886_s20 = scalar_lea.hbm %s2038_s0, %s1177_s1  ;;  %s250_s14 = scalar_lea.sflag [#allocation4], %s249_s17 }
  0x62   : > { %s1533_s18 = scalar_lea.hbm %s1886_s20, 128  ;;  %p1535_p5 = pneg %p1879_p0 }
  0x63   : > { %p1534_p3 = scmp.ne.s32.totalorder %s1886_s20, %s1533_s18  ;;  %s1538_s10 = scalar_lea.hbm %s2038_s0, 768 }
  0x64   : > { %p1539_p12 = scmp.lt.u32.totalorder %s1886_s20, %s2038_s0  ;;  %p1540_p11 = scmp.lt.u32.totalorder %s1538_s10, %s1533_s18 }
  0x65   : > { %p1536_p7 = pnand %p1535_p5, %p1534_p3  ;;  %p1542_p2 = scmp.lt.u32.totalorder %s1533_s18, %s1886_s20 }
  0x66   : > { %p1541_p1 = por %p1540_p11, %p1539_p12 }
  0x67   : > { %p1537_p9 = pneg %p1536_p7 }
  0x68   : > { %p1543_p10 = por %p1542_p2, %p1541_p1 }
  0x6a   : > { %p1544_p4 = pnand %p1543_p10, %p1537_p9 }
  0x6c   : > { %1547 = shalt.err (!%p1544_p4)
}
  0x6d   : > { %s1548_s17 = scalar_lea.vmem %s1870_s6, 128  ;;  %s1671_s12 = smov [#allocation3]  }
  0x6e   : > { %p1549_p8 = scmp.ne.s32.totalorder %s1870_s6, %s1548_s17  ;;  %s1553_s15 = sshll.u32 %s1671_s12, 4  ;;  %s1554_s15 = int_to_ptr.vmem [resolvable:$false] %s1553_s15 }
  0x6f   : > { %s1555_s13 = scalar_lea.vmem %s1554_s15, 256  ;;  %p1556_p7 = scmp.lt.s32.totalorder %s1870_s6, %s1554_s15 }
  0x70   : > { %p1551_p13 = pnand %p1549_p8, %p1535_p5  ;;  %p1557_p12 = scmp.lt.s32.totalorder %s1555_s13, %s1548_s17 }
  0x72   : > { %p1552_p3 = pneg %p1551_p13  ;;  %p1558_p11 = por %p1557_p12, %p1556_p7 }
  0x74   : > { %p1559_p1 = pnand %p1558_p11, %p1552_p3 }
  0x76   : > { %1562 = shalt.err (!%p1559_p1)
}
  0x77   : > { %1290 = dma.hbm_to_vmem [thread:$0]  (!%p1879_p0), %s1886_s20, 128, %s1870_s6, %s250_s14  }
  0x78   : > { %p2074_p9 = scmp.ne.s32.totalorder %s2064_s11, 0 }
  0x79   : > { %s1916_s21 = sand.u32 (!%p2074_p9), 1, %s1641_s22   ;;  %p2075_p5 = scmp.ne.s32.totalorder (!%p2074_p9), %s2061_s9, 0 }
  0x7a   : > { %271 = sbr.rel (%p2074_p9) target bundleno = 740 (0x2e4), region = 44  ;;  %s1179_s18 = sshll.u32 (!%p2074_p9), %s1916_s21, 3 }
  0x7b   : > { %s274_s29 = scalar_lea.sflag (!%p2074_p9), [#allocation4], %s1916_s21  ;;  %s1920_s30 = scalar_lea.vmem (!%p2074_p9), [#allocation3], %s1179_s18 }
  0x81   : > { %1624 = dma.done.wait (%p2075_p5), %s274_s29, 128  }
  0x82   : > { %1626 = vsyncadd (%p2075_p5), %s274_s29, 4294967168  ;;  %p2076_p0 = scmp.ne.s32.totalorder %s2059_s7, 0 }
  0x84   : > { %1628 = dma.done.wait (%p2076_p0), [#allocation7], 8192  }
  0x85   : > { %1630 = vsyncadd (%p2076_p0), [#allocation7], 4294959104  ;;  %s1930_s3 = scalar_lea.vmem [#allocation9], %s1179_s18  ;;  %p1183_p2 = scmp.ne.s32.totalorder %s1649_s24, 0 }
  0x86   : > { %v1672_v0 = vmov (!%p1183_p2), 0  }
  0x87   : > { %318 = sbr.rel (%p1183_p2) target bundleno = 142 (0x8e), region = 60  ;;  %319 = vst [vmem:[#allocation2] sm:$0xf] (!%p1183_p2), %v1672_v0 }
  0x8e PF: > { %v1377_v1 = vld [vmem:[#allocation6 + $0x84] ss:$8 sps:$4 sm:$0xff]   ;;  %v1673_v3 = vmov 0   ;;  %v1381_v4 = vld [vmem:[#allocation6 + $0x80] ss:$8 sps:$4 sm:$0xff]   ;;  %v320_v28 = vld [vmem:[%s1920_s30] sm:$0xff] }
  0x8f   : > { %v1379_v2 = vld [vmem:[#allocation6 + $0x4] ss:$8 sps:$4 sm:$0xff]   ;;  %476 = vmatprep.mubr.bf16.mxu0 %v1673_v3  ;;  %600 = vmatprep.mubr.bf16.mxu1 %v1673_v3  ;;  %v1382_v5 = vld [vmem:[#allocation6] ss:$8 sps:$4 sm:$0xff]   ;;  %v1383_v6 = vld [vmem:[#allocation6 + $0x94] ss:$8 sps:$4 sm:$0xff]   ;;  %v321_v29 = vpack.c.bf16 %v320_v28, %v320_v28 }
  0x90   : > { %444 = vmatprep.subr.bf16.mxu0 %v1377_v1  ;;  %568 = vmatprep.subr.bf16.mxu1 %v1379_v2  ;;  %v1385_v7 = vld [vmem:[#allocation6 + $0x14] ss:$8 sps:$4 sm:$0xff]   ;;  %v1387_v8 = vld [vmem:[#allocation6 + $0x90] ss:$8 sps:$4 sm:$0xff]   ;;  %v1389_v10 = vld [vmem:[#allocation6 + $0xa4] ss:$8 sps:$4 sm:$0xff]  }
  0x91   : > { %445 = vmatpush1.bf16.msra.mxu0 %v1381_v4  ;;  %569 = vmatpush1.bf16.msra.mxu1 %v1382_v5  ;;  %v1388_v9 = vld [vmem:[#allocation6 + $0x10] ss:$8 sps:$4 sm:$0xff]   ;;  %v1391_v11 = vld [vmem:[#allocation6 + $0x24] ss:$8 sps:$4 sm:$0xff]   ;;  %v1393_v12 = vld [vmem:[#allocation6 + $0xa0] ss:$8 sps:$4 sm:$0xff]  }
  0x92   : > { %446 = vmatprep.subr.bf16.mxu0 %v1383_v6  ;;  %570 = vmatprep.subr.bf16.mxu1 %v1385_v7  ;;  %v1394_v13 = vld [vmem:[#allocation6 + $0x20] ss:$8 sps:$4 sm:$0xff]   ;;  %v1395_v14 = vld [vmem:[#allocation6 + $0xb4] ss:$8 sps:$4 sm:$0xff]   ;;  %v1399_v16 = vld [vmem:[#allocation6 + $0xb0] ss:$8 sps:$4 sm:$0xff]  }
  0x93   : > { %v1397_v15 = vld [vmem:[#allocation6 + $0x34] ss:$8 sps:$4 sm:$0xff]   ;;  %v1400_v17 = vld [vmem:[#allocation6 + $0x30] ss:$8 sps:$4 sm:$0xff]   ;;  %v1401_v18 = vld [vmem:[#allocation6 + $0xc4] ss:$8 sps:$4 sm:$0xff]  }
  0x94   : > { %v1403_v19 = vld [vmem:[#allocation6 + $0x44] ss:$8 sps:$4 sm:$0xff]   ;;  %v1405_v20 = vld [vmem:[#allocation6 + $0xc0] ss:$8 sps:$4 sm:$0xff]   ;;  %v1407_v22 = vld [vmem:[#allocation6 + $0xd4] ss:$8 sps:$4 sm:$0xff]  }
  0x95   : > { %447 = vmatpush1.bf16.msra.mxu0 %v1387_v8  ;;  %571 = vmatpush1.bf16.msra.mxu1 %v1388_v9  ;;  %v1406_v21 = vld [vmem:[#allocation6 + $0x40] ss:$8 sps:$4 sm:$0xff]   ;;  %v1409_v23 = vld [vmem:[#allocation6 + $0x54] ss:$8 sps:$4 sm:$0xff]   ;;  %v1411_v24 = vld [vmem:[#allocation6 + $0xd0] ss:$8 sps:$4 sm:$0xff]  }
  0x96   : > { %448 = vmatprep.subr.bf16.mxu0 %v1389_v10  ;;  %572 = vmatprep.subr.bf16.mxu1 %v1391_v11  ;;  %v1412_v25 = vld [vmem:[#allocation6 + $0x50] ss:$8 sps:$4 sm:$0xff]   ;;  %v1413_v26 = vld [vmem:[#allocation6 + $0xe4] ss:$8 sps:$4 sm:$0xff]   ;;  %v1417_v30 = vld [vmem:[#allocation6 + $0xe0] ss:$8 sps:$4 sm:$0xff]  }
  0x97   : > { %v1415_v27 = vld [vmem:[#allocation6 + $0x64] ss:$8 sps:$4 sm:$0xff]   ;;  %v1418_v31 = vld [vmem:[#allocation6 + $0x60] ss:$8 sps:$4 sm:$0xff]   ;;  %v323_v32 = vrot.slane %v321_v29, 4  ;;  %s1233_s7 = sshll.u32 %s1649_s24, 3 }
  0x98   : > { %v1419_v33 = vld [vmem:[#allocation6 + $0xf4] ss:$8 sps:$4 sm:$0xff]   ;;  %v1423_v35 = vld [vmem:[#allocation6 + $0xf0] ss:$8 sps:$4 sm:$0xff]   ;;  %v1427_v37 = vld [vmem:[#allocation6 + $0x104] ss:$8 sps:$4 sm:$0xff]  }
  0x99   : > { %449 = vmatpush1.bf16.msra.mxu0 %v1393_v12  ;;  %573 = vmatpush1.bf16.msra.mxu1 %v1394_v13  ;;  %v1421_v34 = vld [vmem:[#allocation6 + $0x74] ss:$8 sps:$4 sm:$0xff]   ;;  %325 = vst [vmem:[#allocation2] sm:$0xf0] %v323_v32  ;;  %v1424_v36 = vld [vmem:[#allocation6 + $0x70] ss:$8 sps:$4 sm:$0xff]  }
  0x9a   : > { %450 = vmatprep.subr.bf16.mxu0 %v1395_v14  ;;  %574 = vmatprep.subr.bf16.mxu1 %v1397_v15  ;;  %v1425_v38 = vld [vmem:[#allocation6 + $0x100] ss:$8 sps:$4 sm:$0xff]   ;;  %v1430_v45 = vld [vmem:[#allocation6 + $0x114] ss:$8 sps:$4 sm:$0xff]   ;;  %v1428_v46 = vld [vmem:[#allocation6 + $0x110] ss:$8 sps:$4 sm:$0xff]  }
  0x9b   : > { %v1433_v47 = vld [vmem:[#allocation6 + $0x124] ss:$8 sps:$4 sm:$0xff]   ;;  %v1431_v48 = vld [vmem:[#allocation6 + $0x120] ss:$8 sps:$4 sm:$0xff]   ;;  %v1436_v49 = vld [vmem:[#allocation6 + $0x134] ss:$8 sps:$4 sm:$0xff]  }
  0x9c   : > { %v1434_v50 = vld [vmem:[#allocation6 + $0x130] ss:$8 sps:$4 sm:$0xff]   ;;  %v1439_v51 = vld [vmem:[#allocation6 + $0x144] ss:$8 sps:$4 sm:$0xff]   ;;  %v1437_v52 = vld [vmem:[#allocation6 + $0x140] ss:$8 sps:$4 sm:$0xff]  }
  0x9d   : > { %451 = vmatpush1.bf16.msra.mxu0 %v1399_v16  ;;  %575 = vmatpush1.bf16.msra.mxu1 %v1400_v17  ;;  %v1442_v53 = vld [vmem:[#allocation6 + $0x154] ss:$8 sps:$4 sm:$0xff]   ;;  %v1440_v54 = vld [vmem:[#allocation6 + $0x150] ss:$8 sps:$4 sm:$0xff]   ;;  %v1445_v55 = vld [vmem:[#allocation6 + $0x164] ss:$8 sps:$4 sm:$0xff]  }
  0x9e   : > { %452 = vmatprep.subr.bf16.mxu0 %v1401_v18  ;;  %576 = vmatprep.subr.bf16.mxu1 %v1403_v19  ;;  %v1443_v56 = vld [vmem:[#allocation6 + $0x160] ss:$8 sps:$4 sm:$0xff]   ;;  %v1448_v57 = vld [vmem:[#allocation6 + $0x174] ss:$8 sps:$4 sm:$0xff]   ;;  %v1446_v58 = vld [vmem:[#allocation6 + $0x170] ss:$8 sps:$4 sm:$0xff]  }
  0x9f   : > { %v1451_v61 = vld [vmem:[#allocation8 + $0x4] ss:$8 sps:$4 sm:$0xff]   ;;  %v1449_v62 = vld [vmem:[#allocation8] ss:$8 sps:$4 sm:$0xff]   ;;  %v1454_v63 = vld [vmem:[#allocation8 + $0x14] ss:$8 sps:$4 sm:$0xff]  }
  0xa0   : > { %v343_v39 = vld [vmem:[#allocation2] sm:$0x78]  ;;  %v1452_v0 = vld [vmem:[#allocation8 + $0x10] ss:$8 sps:$4 sm:$0xff]   ;;  %v1466_v7 = vld [vmem:[#allocation8 + $0x54] ss:$8 sps:$4 sm:$0xff]  }
  0xa1   : > { %453 = vmatpush1.bf16.msra.mxu0 %v1405_v20  ;;  %577 = vmatpush1.bf16.msra.mxu1 %v1406_v21  ;;  %v326_v40 = vld [vmem:[#allocation2] sm:$0x3c]  ;;  %v1043_v41 = vld [vmem:[#allocation2] sm:$0xc0]  ;;  %v362_v42 = vrot.slane %v343_v39, 3  ;;  %s1267_s14 = smul.u32 6, %s1653_s25 }
  0xa2   : > { %454 = vmatprep.subr.bf16.mxu0 %v1407_v22  ;;  %578 = vmatprep.subr.bf16.mxu1 %v1409_v23  ;;  %v486_v43 = vrot.slane %v326_v40, 2  ;;  %v1045_v44 = vrot.slane %v1043_v41, 4  ;;  %v609_v59 = vld [vmem:[#allocation2] sm:$0xf0]  ;;  %v1455_v2 = vld [vmem:[#allocation8 + $0x20] ss:$8 sps:$4 sm:$0xff]   ;;  %v762_v23 = vlaneseq }
  0xa3   : > { %v628_v60 = vrot.slane %v609_v59, 4  ;;  %v1457_v1 = vld [vmem:[#allocation8 + $0x24] ss:$8 sps:$4 sm:$0xff]   ;;  %v1458_v4 = vld [vmem:[#allocation8 + $0x30] ss:$8 sps:$4 sm:$0xff]   ;;  %s1257_s1 = sshll.u32 %s1649_s24, 1 }
  0xa4   : > { %1047 = vst [vmem:[#allocation2] sm:$0xc] %v1045_v44  ;;  %v1461_v5 = vld [vmem:[#allocation8 + $0x40] ss:$8 sps:$4 sm:$0xff]   ;;  %v1463_v6 = vld [vmem:[#allocation8 + $0x44] ss:$8 sps:$4 sm:$0xff]   ;;  %s1061_s12 = sadd.s32 %s1267_s14, %s1257_s1 }
  0xa5   : > { %455 = vmatpush1.bf16.msra.mxu0 %v1411_v24  ;;  %579 = vmatpush1.bf16.msra.mxu1 %v1412_v25  ;;  %v1464_v8 = vld [vmem:[#allocation8 + $0x50] ss:$8 sps:$4 sm:$0xff]   ;;  %v1469_v9 = vld [vmem:[#allocation8 + $0x64] ss:$8 sps:$4 sm:$0xff]   ;;  %v1467_v10 = vld [vmem:[#allocation8 + $0x60] ss:$8 sps:$4 sm:$0xff]   ;;  %v764_v25 = vstv %s1233_s7 }
  0xa6   : > { %456 = vmatprep.subr.bf16.mxu0 %v1413_v26  ;;  %580 = vmatprep.subr.bf16.mxu1 %v1415_v27  ;;  %v1472_v11 = vld [vmem:[#allocation8 + $0x74] ss:$8 sps:$4 sm:$0xff]   ;;  %v1470_v12 = vld [vmem:[#allocation8 + $0x70] ss:$8 sps:$4 sm:$0xff]   ;;  %v1939_v24 = vshrl.u32 %v762_v23, 7  ;;  %s1258_s15 = sshll.u32 %s1061_s12, 6 }
  0xa7   : > { %v1232_v28 = vld [vmem:[%s2040_s2] ss:$0 sm:$0xff]  ;;  %s1065_s25 = sshll.u32 %s1930_s3, 4  ;;  %s2078_s18 = sld [smem:[#allocation19_spill]]  ;;  %s1985_s25 = int_to_ptr.vmem [resolvable:$true] %s1065_s25 }
  0xa8   : > { %v765_v26 = vadd.s32 %v764_v25, %v1939_v24  ;;  %s1049_s30 = scalar_lea.sflag [#allocation5], %s1916_s21  ;;  %s1563_s7 = scalar_lea.vmem %s1985_s25, 128 }
  0xa9   : > { %457 = vmatpush1.bf16.msra.mxu0 %v1417_v30  ;;  %581 = vmatpush1.bf16.msra.mxu1 %v1418_v31  ;;  %p1564_p10 = scmp.ne.s32.totalorder %s1985_s25, %s1563_s7  ;;  %s1680_s9 = smov [#allocation9]  }
  0xaa   : > { %458 = vmatprep.subr.bf16.mxu0 %v1419_v33  ;;  %582 = vmatprep.subr.bf16.mxu1 %v1421_v34  ;;  %vm766_vm0 = vcmp.ge.s32.totalorder %v765_v26, 4  ;;  %s1567_s11 = sshll.u32 %s1680_s9, 4  ;;  %s1568_s11 = int_to_ptr.vmem [resolvable:$false] %s1567_s11 }
  0xab   : > { %p1565_p4 = pnand %p1564_p10, %p1858_p6  ;;  %s1569_s6 = scalar_lea.vmem %s1568_s11, 256 }
  0xac   : > { %p1570_p13 = scmp.lt.s32.totalorder %s1985_s25, %s1568_s11  ;;  %p1571_p3 = scmp.lt.s32.totalorder %s1569_s6, %s1563_s7 }
  0xad   : > { %459 = vmatpush1.bf16.msra.mxu0 %v1423_v35  ;;  %583 = vmatpush1.bf16.msra.mxu1 %v1424_v36  ;;  %s1983_s29 = scalar_lea.hbm %s2078_s18, %s1258_s15  ;;  %p1566_p8 = pneg %p1565_p4 }
  0xae   : > { %710 = vmatprep.subr.bf16.mxu0 %v1427_v37  ;;  %983 = vmatprep.subr.bf16.mxu1 %v1451_v61  ;;  %p1572_p7 = por %p1571_p3, %p1570_p13 }
  0xb0   : > { %477 = vmatmul.mubr.bf16.vlgmr.msra.gmra.mrb[0].mxu0 %v362_v42  ;;  %601 = vmatmul.mubr.bf16.vlgmr.msra.gmra.mrb[0].mxu1 %v486_v43  ;;  %p1573_p12 = pnand %p1572_p7, %p1566_p8 }
  0xb1   : > { %711 = vmatpush1.bf16.msra.mxu0 %v1425_v38  ;;  %742 = vmatprep.mubr.bf16.mxu0 %v1673_v3 }
  0xb2   : > { %712 = vmatprep.subr.bf16.mxu0 %v1430_v45  ;;  %1015 = vmatprep.mubr.bf16.mxu1 %v1673_v3  ;;  %v1460_v3 = vld [vmem:[#allocation8 + $0x34] ss:$8 sps:$4 sm:$0xff]  }
  0xb3   : > { %984 = vmatpush1.bf16.msra.mxu1 %v1449_v62 }
  0xb4   : > { %985 = vmatprep.subr.bf16.mxu1 %v1454_v63 }
  0xb5   : > { %713 = vmatpush1.bf16.msra.mxu0 %v1428_v46  ;;  %v1674_v46 = vmov 683565275  }
  0xb6   : > { %714 = vmatprep.subr.bf16.mxu0 %v1433_v47 }
  0xb7   : > { %986 = vmatpush1.bf16.msra.mxu1 %v1452_v0 }
  0xb8   : > { %987 = vmatprep.subr.bf16.mxu1 %v1457_v1 }
  0xb9   : > { %715 = vmatpush1.bf16.msra.mxu0 %v1431_v48  ;;  %v1675_v48 = vmov 2475754826  }
  0xba   : > { %716 = vmatprep.subr.bf16.mxu0 %v1436_v49 }
  0xbb   : > { %988 = vmatpush1.bf16.msra.mxu1 %v1455_v2 }
  0xbc   : > { %989 = vmatprep.subr.bf16.mxu1 %v1460_v3 }
  0xbd   : > { %717 = vmatpush1.bf16.msra.mxu0 %v1434_v50 }
  0xbe   : > { %718 = vmatprep.subr.bf16.mxu0 %v1439_v51  ;;  %v1676_v51 = vmov 2131351028  }
  0xbf   : > { %990 = vmatpush1.bf16.msra.mxu1 %v1458_v4 }
  0xc0   : > { %991 = vmatprep.subr.bf16.mxu1 %v1463_v6 }
  0xc1   : > { %719 = vmatpush1.bf16.msra.mxu0 %v1437_v52 }
  0xc2   : > { %720 = vmatprep.subr.bf16.mxu0 %v1442_v53 }
  0xc3   : > { %992 = vmatpush1.bf16.msra.mxu1 %v1461_v5 }
  0xc4   : > { %993 = vmatprep.subr.bf16.mxu1 %v1466_v7 }
  0xc5   : > { %721 = vmatpush1.bf16.msra.mxu0 %v1440_v54  ;;  %v1677_v54 = vmov 2102212464  }
  0xc6   : > { %722 = vmatprep.subr.bf16.mxu0 %v1445_v55 }
  0xc7   : > { %994 = vmatpush1.bf16.msra.mxu1 %v1464_v8 }
  0xc8   : > { %995 = vmatprep.subr.bf16.mxu1 %v1469_v9 }
  0xc9   : > { %723 = vmatpush1.bf16.msra.mxu0 %v1443_v56 }
  0xca   : > { %724 = vmatprep.subr.bf16.mxu0 %v1448_v57  ;;  %v1678_v57 = vmov 920167782  }
  0xcb   : > { %996 = vmatpush1.bf16.msra.mxu1 %v1467_v10 }
  0xcc   : > { %997 = vmatprep.subr.bf16.mxu1 %v1472_v11 }
  0xcd   : > { %725 = vmatpush1.bf16.msra.mxu0 %v1446_v58 }
  0xcf   : > { %998 = vmatpush1.bf16.msra.mxu1 %v1470_v12 }
  0xd0   : > { %743 = vmatmul.mubr.bf16.vlgmr.msra.gmra.mrb[4].mxu0 %v628_v60  ;;  %v1679_v60 = vmov 1326507024  }
 0x183   : > { %v478_v13 = vpop.f32.mrb[0].mxu0  ;;  %v602_v14 = vpop.f32.mrb[0].mxu1 }
 0x184   : > { %v603_v15 = vadd.f32 %v602_v14, %v478_v13  ;;  %v480_v16 = vpop.f32.mrb[1].mxu0  ;;  %v604_v17 = vpop.f32.mrb[1].mxu1 }
 0x185   : > { %v605_v18 = vadd.f32 %v604_v17, %v480_v16  ;;  %v482_v19 = vpop.f32.mrb[2].mxu0  ;;  %v606_v20 = vpop.f32.mrb[2].mxu1 }
 0x186   : > { %v483_v21 = vpop.f32.mrb[3].mxu0  ;;  %v607_v22 = vpop.f32.mrb[3].mxu1 }
 0x1a3   : > { %v744_v27 = vpop.f32.mrb[4].mxu0 }
 0x1a4   : > { %v751_v29 = vadd.f32 %v744_v27, %v603_v15  ;;  %v746_v30 = vpop.f32.mrb[5].mxu0 }
 0x1a5   : > { %v1945_v31 = vadd.f32 %v746_v30, %v605_v18  ;;  %v748_v32 = vpop.f32.mrb[6].mxu0 }
 0x1a6   : > { %v760_v33 = vadd.f32 %v1232_v28, %v751_v29  ;;  %v749_v34 = vpop.f32.mrb[7].mxu0 }
 0x1a8   : > { %v1947_v35 = vsel %vm766_vm0, %v760_v33, 0.0 }
 0x1a9   : > { %v773_v36 = vand.u32 2139095040, %v1947_v35  ;;  %v770_v40 = vand.u32 2147483647, %v1947_v35  ;;  %vm772_vm8 = vcmp.lt.s32.totalorder %v1947_v35, 0  ;;  %vm862_vm13 = vweird.f32 %v1947_v35 }
 0x1ab   : > { %v774_v37 = vshrl.u32 %v773_v36, 23  ;;  %v777_v43 = vand.u32 8388607, %v770_v40  ;;  %vm771_vm9 = vcmp.le.f32.partialorder %v770_v40, 0.7853982 }
 0x1ad   : > { %v1234_v38 = vadd.s32 4294967169, %v774_v37  ;;  %v778_v62 = vor.u32 8388608, %v777_v43 }
 0x1af   : > { %v780_v39 = vadd.s32 1, %v1234_v38  ;;  %v818_v12 = vshll.u32 %v778_v62, 8 }
 0x1b1   : > { %vm781_vm1 = vcmp.gt.s32.totalorder %v780_v39, 0 }
 0x1b2   : > { %v782_v41 = vsel %vm781_vm1, %v780_v39, 0 }
 0x1b3   : > { %v784_v42 = vand.u32 31, %v782_v41  ;;  %v783_v45 = vshrl.u32 %v782_v41, 5 }
 0x1b5   : > { %v785_v44 = vsub.s32 32, %v784_v42  ;;  %v787_v47 = vshll.u32 %v1674_v46, %v784_v42  ;;  %v790_v49 = vshll.u32 %v1675_v48, %v784_v42  ;;  %v793_v53 = vshll.u32 %v1676_v51, %v784_v42 }
 0x1b6   : > { %v796_v56 = vshll.u32 %v1677_v54, %v784_v42  ;;  %v799_v59 = vshll.u32 %v1678_v57, %v784_v42  ;;  %vm802_vm2 = vcmp.lt.s32.totalorder %v783_v45, 1  ;;  %vm805_vm3 = vcmp.lt.s32.totalorder %v783_v45, 4 }
 0x1b7   : > { %v788_v50 = vshrl.u32 %v1675_v48, %v785_v44  ;;  %v791_v52 = vshrl.u32 %v1676_v51, %v785_v44  ;;  %v794_v55 = vshrl.u32 %v1677_v54, %v785_v44  ;;  %v797_v58 = vshrl.u32 %v1678_v57, %v785_v44 }
 0x1b8   : > { %v800_v61 = vshrl.u32 %v1679_v60, %v785_v44  ;;  %v786_v7 = vshrl.u32 %v1674_v46, %v785_v44  ;;  %vm804_vm4 = vcmp.lt.s32.totalorder %v783_v45, 3  ;;  %vm803_vm5 = vcmp.lt.s32.totalorder %v783_v45, 2 }
 0x1b9   : > { %v789_v63 = vor.u32 %v788_v50, %v787_v47  ;;  %v792_v0 = vor.u32 %v791_v52, %v790_v49  ;;  %v795_v1 = vor.u32 %v794_v55, %v793_v53  ;;  %v798_v2 = vor.u32 %v797_v58, %v796_v56 }
 0x1ba   : > { %v801_v3 = vor.u32 %v800_v61, %v799_v59 }
 0x1bb   : > { %v807_v4 = vsel %vm805_vm3, %v795_v1, 2102212464  ;;  %v810_v5 = vsel %vm802_vm2, %v789_v63, %v792_v0  ;;  %v814_v6 = vsel %vm802_vm2, %v792_v0, %v795_v1  ;;  %v811_v8 = vsel %vm805_vm3, %v798_v2, 920167782 }
 0x1bc   : > { %v815_v9 = vsel %vm805_vm3, %v801_v3, 1326507024  ;;  %v812_v10 = vsel %vm804_vm4, %v795_v1, %v811_v8  ;;  %v806_v13 = vsel %vm802_vm2, %v786_v7, %v789_v63  ;;  %v808_v14 = vsel %vm804_vm4, %v792_v0, %v807_v4  ;;  %v891_v4 = vld [vmem:[%s2042_s4] sm:$0x3] }
 0x1bd   : > { %v816_v11 = vsel %vm804_vm4, %v798_v2, %v815_v9  ;;  %v813_v15 = vsel %vm803_vm5, %v810_v5, %v812_v10  ;;  %v809_v21 = vsel %vm803_vm5, %v806_v13, %v808_v14  ;;  %v895_v3 = vsub.s32 0, %v1939_v24  ;;  %v1254_v7 = vld [vmem:[%s2043_s5] ss:$0 sm:$0xff] }
 0x1be   : > { %v817_v16 = vsel %vm803_vm5, %v814_v6, %v816_v11  ;;  %v1956_v19 = vmul.u32.u64.low %v818_v12, %v813_v15  ;;  %v1957_v20 = vmul.u32.u64.high %v818_v12, %v813_v15, %v1956_v19  ;;  %v825_v23 = vmul.u32 %v818_v12, %v809_v21 }
 0x1bf   : > { %v1953_v17 = vmul.u32.u64.low %v818_v12, %v817_v16  ;;  %v1954_v18 = vmul.u32.u64.high %v818_v12, %v817_v16, %v1953_v17  ;;  %v896_v5 = vrot.slane %v891_v4, %v895_v3  ;;  %v899_v6 = vsub.s32 1, %v1939_v24 }
 0x1c0   : > { %v828_v22 = vadd.s32 1, %v1957_v20  ;;  %v1031_v8 = vadd.f32 %v1254_v7, %v1945_v31 }
 0x1c1   : > { %vm827_vm6 = vc.u32 %v1954_v18, %v1956_v19  ;;  %v826_v38 = vadd.s32 %v1956_v19, %v1954_v18  ;;  %v900_v10 = vrot.slane %v891_v4, %v899_v6 }
 0x1c2   : > { %v829_v25 = vsel %vm827_vm6, %v828_v22, %v1957_v20 }
 0x1c3   : > { %v830_v26 = vadd.s32 %v829_v25, %v825_v23 }
 0x1c5   : > { %v831_v27 = vadd.s32 536870912, %v830_v26 }
 0x1c7   : > { %v832_v28 = vshrl.u32 %v831_v27, 30 }
 0x1c9   : > { %v833_v29 = vshll.u32 %v832_v28, 30  ;;  %v856_v51 = vsub.s32 4, %v832_v28 }
 0x1cb   : > { %v834_v30 = vsub.s32 %v830_v26, %v833_v29  ;;  %v857_v54 = vsel %vm772_vm8, %v856_v51, %v832_v28 }
 0x1cc   : > { %v859_v56 = vsel %vm771_vm9, 0, %v857_v54 }
 0x1cd   : > { %v836_v32 = vsub.s32 0, %v834_v30  ;;  %v863_v57 = vadd.s32 3, %v859_v56 }
 0x1cf   : > { %v1235_v33 = vmin.u32 %v836_v32, %v834_v30  ;;  %v864_v58 = vand.u32 3, %v863_v57 }
 0x1d1   : > { %v838_v34 = vclz %v1235_v33  ;;  %vm869_vm10 = vcmp.eq.s32.totalorder %v864_v58, 2  ;;  %vm866_vm11 = vcmp.eq.s32.totalorder %v864_v58, 0  ;;  %vm865_vm12 = vcmp.lt.s32.totalorder %v864_v58, 2 }
 0x1d3   : > { %v1236_v36 = vadd.s32 4294967294, %v838_v34 }
 0x1d5   : > { %vm1237_vm7 = vcmp.lt.s32.totalorder %v1236_v36, 0 }
 0x1d6   : > { %v841_v37 = vsel %vm1237_vm7, 0, %v1236_v36 }
 0x1d7   : > { %v842_v39 = vsub.s32 32, %v841_v37  ;;  %v846_v41 = vsub.s32 4294967266, %v841_v37  ;;  %v843_v42 = vshll.u32 %v834_v30, %v841_v37 }
 0x1d9   : > { %v844_v43 = vshrl.u32 %v826_v38, %v842_v39  ;;  %v847_v44 = vadd.s32 127, %v846_v41 }
 0x1db   : > { %v845_v45 = vor.u32 %v844_v43, %v843_v42  ;;  %v848_v46 = vshll.u32 %v847_v44, 23 }
 0x1dd   : > { %v849_v47 = vor.u32 4788187, %v848_v46  ;;  %v852_v49 = vcvt.s32.f32 %v845_v45 }
 0x1df   : > { %v850_v48 = vand.u32 2147483647, %v849_v47 }
 0x1e1   : > { %v853_v50 = vmul.f32 %v852_v49, %v850_v48 }
 0x1e3   : > { %v854_v52 = vxor.u32 2147483648, %v853_v50 }
 0x1e5   : > { %v855_v53 = vsel %vm772_vm8, %v854_v52, %v853_v50 }
 0x1e6   : > { %v858_v55 = vsel %vm771_vm9, %v1947_v35, %v855_v53 }
 0x1e7   : > { %1473 = vcosq.f32 %v858_v55 }
 0x1e8   : > { %1475 = vsinq.f32 %v858_v55 }
 0x1f1   : > { %v1474_v59 = vpop.eup %1473 }
 0x1f2   : > { %v1476_v60 = vpop.eup %1475  ;;  %v870_v61 = vxor.u32 2147483648, %v1474_v59 }
 0x1f3   : > { %v867_v62 = vxor.u32 2147483648, %v1476_v60 }
 0x1f4   : > { %v871_v63 = vsel %vm869_vm10, %v870_v61, %v1476_v60 }
 0x1f5   : > { %v868_v40 = vsel %vm866_vm11, %v1474_v59, %v867_v62 }
 0x1f6   : > { %v872_v0 = vsel %vm865_vm12, %v868_v40, %v871_v63 }
 0x1f7   : > { %v873_v1 = vsel %vm862_vm13, nan, %v872_v0 }
 0x1f8   : > { %v874_v2 = vpack.c.bf16 %v873_v1, %v873_v1 }
 0x1fa   : > { %1016 = vmatmul.mubr.bf16.vlgmr.msra.gmra.mrb[4].mxu1 %v874_v2 }
 0x2cd   : > { %v1017_v35 = vpop.f32.mrb[4].mxu1 }
 0x2ce   : > { %v1018_v9 = vadd.f32 %v1017_v35, %v896_v5  ;;  %v1019_v11 = vpop.f32.mrb[5].mxu1 }
 0x2cf   : > { %v1021_v12 = vpop.f32.mrb[6].mxu1  ;;  %v1020_v15 = vadd.f32 %v1019_v11, %v900_v10 }
 0x2d0   : > { %v1032_v13 = vadd.f32 %v1031_v8, %v1018_v9  ;;  %v1022_v14 = vpop.f32.mrb[7].mxu1 }
 0x2d2   : > { %v1033_v24 = vmul.f32 0.5, %v1032_v13 }
 0x2d4   : > { %v1261_v16 = vpack.c.bf16 %v1020_v15, %v1033_v24 }
 0x2d6   : > { %1042 = vst [vmem:[%s1930_s3] sm:$0xff] %v1261_v16 }
 0x2d7   : > { %1576 = shalt.err (!%p1573_p12)
}
 0x2d8   : > { %s1577_s21 = scalar_lea.hbm %s1983_s29, 128  ;;  %s1581_s14 = scalar_lea.hbm %s2078_s18, 768 }
 0x2d9   : > { %p1578_p11 = scmp.ne.s32.totalorder %s1983_s29, %s1577_s21  ;;  %p1582_p5 = scmp.lt.u32.totalorder %s1983_s29, %s2078_s18 }
 0x2da   : > { %p1583_p0 = scmp.lt.u32.totalorder %s1581_s14, %s1577_s21  ;;  %p1585_p10 = scmp.lt.u32.totalorder %s1577_s21, %s1983_s29 }
 0x2db   : > { %p1579_p1 = pnand %p1578_p11, %p1858_p6 }
 0x2dc   : > { %p1584_p2 = por %p1583_p0, %p1582_p5 }
 0x2dd   : > { %p1580_p9 = pneg %p1579_p1 }
 0x2de   : > { %p1586_p4 = por %p1585_p10, %p1584_p2 }
 0x2e0   : > { %p1587_p8 = pnand %p1586_p4, %p1580_p9 }
 0x2e2   : > { %1590 = shalt.err (!%p1587_p8)
}
 0x2e3   : > { %1278 = dma.vmem_to_hbm [thread:$0]  (%p1858_p6), %s1985_s25, 128, %s1983_s29, %s1049_s30  }
 0x2e4 PF: > { %s2079_s1 = sld [smem:[#allocation13_spill]]  ;;  %s2080_s12 = sld [smem:[#allocation14_spill]] }
 0x2e5   : > { %p1300_p13 = scmp.ge.s32.totalorder %s1665_s28, 2 }
 0x2ea   : > { %s1077_s15 = sand.u32 1, %s2079_s1   ;;  %p2081_p3 = scmp.ne.s32.totalorder %s2080_s12, 0 }
 0x2eb   : > { %s1078_s13 = scalar_lea.sflag [#allocation5], %s1077_s15 }
 0x2ec   : > { %p1292_p7 = pnand %p1300_p13, %p2081_p3 }
 0x2ee   : > { %1632 = dma.done.wait (!%p1292_p7), %s1078_s13, 128  }
 0x2ef   : > { %1634 = vsyncadd (!%p1292_p7), %s1078_s13, 4294967168  ;;  %s23_s28 = sadd.s32 1, %s1665_s28   ;;  %s2082_s17 = sld [smem:[#allocation15_spill]] }
 0x2f0   : > { %p20_p12 = scmp.ge.s32.totalorder %s23_s28, 8   ;;  %s2083_s21 = smov %s1641_s22 }
 0x2f1   : > { %s2084_s22 = smov %s1645_s23  ;;  %s2085_s23 = smov %s1873_s8 }
 0x2f2   : > { %s2086_s24 = smov %s1657_s26  ;;  %s2087_s25 = smov %s1661_s27 }
 0x2f3   : > { %s2089_s27 = smov %s2095_s19  ;;  %22 = sbr.rel (!%p20_p12) target bundleno = 12 (0xc), region = 103 }
 0x2f5   : > { %s2088_s26 = smov %s2082_s17 }
 0x2fa   :  { %1083 = vsyncpa [#allocation4], 1 }
 0x2fb   :  { %1085 = vsyncpa [#allocation4 + $0x1], 1 }
 0x2fc   :  { %1086 = vsyncpa [#allocation7], 1 }
 0x2fd   :  { %1087 = vsyncpa [#allocation5], 1 }
 0x2fe   :  { %1089 = vsyncpa [#allocation5 + $0x1], 1 }

</bundles_post_ra>
